<compile_context>
chip_gen: v6e
topology: v6e:2x2x1
jax: 0.10.0
libtpu: 0.0.40
codegen_flags: <defaults>
</compile_context>

<pallas_src>
import functools

import jax
import jax.numpy as jnp
from jax.experimental import pallas as pl
from jax.experimental.pallas import tpu as pltpu


# ---------------------------------------------------------------------------
# tiling / padding helpers
# ---------------------------------------------------------------------------
_LANE = 128
_MAX_ROW_TILE = 1024           # output/row axis of the adjacency (sublanes)
_MAX_RED_TILE = 2048           # reduction axis of the adjacency (lanes)
_S_RESIDENT_BYTES = 16 << 20   # keep S = X@W resident in VMEM if it fits this
_MIB = 1 << 20


def _round_up(x, m):
    return ((x + m - 1) // m) * m


def _node_tiling(n):
    """Pick (tm, tk, n_p) for one node dimension.

    Pad to 128 first; allow at most ~6% further tile padding when choosing the
    reduction tile (up to 2048); the row tile (up to 1024) is a divisor of the
    padded extent and prefers >= 2 row tiles so the 'parallel' row axis can
    shard across both v7x TensorCores."""
    n_128 = _round_up(n, _LANE)
    slack = n_128 // 16
    tk = _LANE
    for t in range(_LANE, min(_MAX_RED_TILE, n_128) + 1, _LANE):
        if _round_up(n_128, t) - n_128 <= slack:
            tk = t
    n_p = _round_up(n_128, tk)

    units = n_p // _LANE
    cap_units = max(1, _MAX_ROW_TILE // _LANE)
    tm_units = 1
    for d in range(1, min(cap_units, units) + 1):
        if units % d == 0 and (units // d >= 2 or units == 1):
            tm_units = d
    return tm_units * _LANE, tk, n_p


def _pad2d(a, rows, cols, dtype):
    a = a.astype(dtype)
    return jnp.pad(a, ((0, rows - a.shape[0]), (0, cols - a.shape[1])))


def _pad_bias(b, cols):
    return jnp.pad(b.astype(jnp.float32), (0, cols - b.shape[0])).reshape(1, cols)


def _compiler_params(vmem_bytes):
    # Scoped-VMEM defaults (16 MiB v5e / 32 MiB v6e,v7x) are too small for the
    # larger adj tiles; cap at 64 MiB so the request also fits v7x's physical VMEM.
    limit = min(max(int(vmem_bytes) + 8 * _MIB, 32 * _MIB), 64 * _MIB)
    return pltpu.CompilerParams(
        dimension_semantics=("parallel", "arbitrary"),
        vmem_limit_bytes=limit)


def _s_spec(s, tk, s_resident):
    """BlockSpec for the hoisted projection S = X@W: fully resident (DMA'd once,
    constant index_map) when it fits the budget, else streamed per k tile."""
    if s_resident:
        return pl.BlockSpec(s.shape, lambda i, k: (0, 0))
    return pl.BlockSpec((tk, s.shape[1]), lambda i, k: (k, 0))


# ---------------------------------------------------------------------------
# Pallas kernel bodies
# ---------------------------------------------------------------------------
def _gcn_kernel(adj_ref, s_ref, b_ref, o_ref, acc_ref, *, alpha, tk, s_resident):
    """One (row-tile, k-tile) step of LeakyReLU(adj @ S + b); S = X@W hoisted."""
    k = pl.program_id(1)

    @pl.when(k == 0)
    def _init():
        acc_ref[...] = jnp.zeros_like(acc_ref)

    if s_resident:
        start = pl.multiple_of(k * tk, _LANE)
        s = s_ref[pl.ds(start, tk), :]
    else:
        s = s_ref[...]
    acc_ref[...] += jnp.dot(adj_ref[...], s, preferred_element_type=jnp.float32)

    @pl.when(k == pl.num_programs(1) - 1)
    def _finalize():
        h = acc_ref[...] + b_ref[...]
        o_ref[...] = jnp.maximum(h, alpha * h).astype(o_ref.dtype)


def _gcn_union_kernel(adj_ref, s_ref, b_ref, own_ref, wuh_ref, wux_ref, bu_ref,
                      o_ref, *, alpha, tk, s_resident):
    """GCN pass accumulated directly in the resident f32 output block, then a
    fused union Linear (cat(h, own) @ Wu^T + bu) + ReLU epilogue."""
    k = pl.program_id(1)

    @pl.when(k == 0)
    def _init():
        o_ref[...] = jnp.zeros_like(o_ref)

    if s_resident:
        start = pl.multiple_of(k * tk, _LANE)
        s = s_ref[pl.ds(start, tk), :]
    else:
        s = s_ref[...]
    o_ref[...] += jnp.dot(adj_ref[...], s, preferred_element_type=jnp.float32)

    @pl.when(k == pl.num_programs(1) - 1)
    def _finalize():
        h = o_ref[...] + b_ref[...]
        h = jnp.maximum(h, alpha * h)                       # GCN output (f32)
        y = jnp.dot(h.astype(jnp.bfloat16), wuh_ref[...],
                    preferred_element_type=jnp.float32)
        y += jnp.dot(own_ref[...], wux_ref[...],
                     preferred_element_type=jnp.float32)
        y += bu_ref[...]
        o_ref[...] = jnp.maximum(y, 0.0)


def _dual_gcn_union_kernel(adj_ref, s_ref, b_ref, own_ref, wuh_ref, wux_ref,
                           bu_ref, oa_ref, ou_ref, acc_ref,
                           *, alpha, tk, split, s_resident):
    """Two GCNs share one adjacency pass via a single N=256 matmul
    (S = [S_a | S_b] concatenated on lanes); branch B gets a fused union+ReLU."""
    k = pl.program_id(1)

    @pl.when(k == 0)
    def _init():
        acc_ref[...] = jnp.zeros_like(acc_ref)

    if s_resident:
        start = pl.multiple_of(k * tk, _LANE)
        s = s_ref[pl.ds(start, tk), :]
    else:
        s = s_ref[...]
    acc_ref[...] += jnp.dot(adj_ref[...], s, preferred_element_type=jnp.float32)

    @pl.when(k == pl.num_programs(1) - 1)
    def _finalize():
        h = acc_ref[...] + b_ref[...]          # concatenated bias [b_a | b_b]
        h = jnp.maximum(h, alpha * h)
        oa_ref[...] = h[:, :split].astype(oa_ref.dtype)     # branch-A GCN out (bf16)
        hb = h[:, split:]                                   # branch-B GCN out (f32)
        y = jnp.dot(hb.astype(jnp.bfloat16), wuh_ref[...],
                    preferred_element_type=jnp.float32)
        y += jnp.dot(own_ref[...], wux_ref[...],
                     preferred_element_type=jnp.float32)
        y += bu_ref[...]
        ou_ref[...] = jnp.maximum(y, 0.0)


# ---------------------------------------------------------------------------
# pallas_call wrappers
# ---------------------------------------------------------------------------
def gcn_pallas(adj_p, s_p, b_p, *, tm, tk, alpha, out_dtype):
    n_out_p, n_in_p = adj_p.shape
    f_out = s_p.shape[1]
    grid = (n_out_p // tm, n_in_p // tk)
    s_resident = s_p.size * 2 <= _S_RESIDENT_BYTES
    out_isz = 2 if out_dtype == jnp.bfloat16 else 4

    flops = 2 * n_out_p * n_in_p * f_out
    s_bytes = s_p.size * 2 * (1 if s_resident else grid[0])
    bytes_accessed = adj_p.size * 2 + s_bytes + n_out_p * f_out * out_isz
    vmem = (2 * tm * tk * 2
            + (s_p.size * 2 if s_resident else 2 * tk * f_out * 2)
            + 2 * tm * f_out * out_isz + tm * f_out * 4 + _MIB)

    return pl.pallas_call(
        functools.partial(_gcn_kernel, alpha=alpha, tk=tk, s_resident=s_resident),
        grid=grid,
        in_specs=[
            pl.BlockSpec((tm, tk), lambda i, k: (i, k)),        # adj tile
            _s_spec(s_p, tk, s_resident),                       # S = X@W (hoisted)
            pl.BlockSpec((1, f_out), lambda i, k: (0, 0)),      # bias
        ],
        out_specs=pl.BlockSpec((tm, f_out), lambda i, k: (i, 0)),
        out_shape=jax.ShapeDtypeStruct((n_out_p, f_out), out_dtype),
        scratch_shapes=[pltpu.VMEM((tm, f_out), jnp.float32)],
        compiler_params=_compiler_params(vmem),
        cost_estimate=pl.CostEstimate(flops=int(flops), transcendentals=0,
                                      bytes_accessed=int(bytes_accessed)),
    )(adj_p, s_p, b_p)


def gcn_union_pallas(adj_p, s_p, b_p, own_p, wuh_p, wux_p, bu_p, *, tm, tk, alpha):
    n_out_p, n_in_p = adj_p.shape
    f_mid = s_p.shape[1]
    f_own = own_p.shape[1]
    f_out = wuh_p.shape[1]
    assert f_mid == f_out      # accumulate-in-output requires matching widths
    grid = (n_out_p // tm, n_in_p // tk)
    s_resident = s_p.size * 2 <= _S_RESIDENT_BYTES

    flops = 2 * n_out_p * n_in_p * f_mid + 2 * n_out_p * (f_mid + f_own) * f_out
    s_bytes = s_p.size * 2 * (1 if s_resident else grid[0])
    bytes_accessed = (adj_p.size * 2 + s_bytes + own_p.size * 2
                      + (wuh_p.size + wux_p.size) * 2 + n_out_p * f_out * 4)
    vmem = (2 * tm * tk * 2
            + (s_p.size * 2 if s_resident else 2 * tk * f_mid * 2)
            + 2 * tm * f_own * 2 + 2 * tm * f_out * 4
            + (wuh_p.size + wux_p.size) * 2 + _MIB)

    return pl.pallas_call(
        functools.partial(_gcn_union_kernel, alpha=alpha, tk=tk,
                          s_resident=s_resident),
        grid=grid,
        in_specs=[
            pl.BlockSpec((tm, tk), lambda i, k: (i, k)),         # adj tile
            _s_spec(s_p, tk, s_resident),                        # S = X@W
            pl.BlockSpec((1, f_mid), lambda i, k: (0, 0)),       # GCN bias
            pl.BlockSpec((tm, f_own), lambda i, k: (i, 0)),      # own feature rows
            pl.BlockSpec((f_mid, f_out), lambda i, k: (0, 0)),   # union W (GCN half, pre-T)
            pl.BlockSpec((f_own, f_out), lambda i, k: (0, 0)),   # union W (feat half, pre-T)
            pl.BlockSpec((1, f_out), lambda i, k: (0, 0)),       # union bias
        ],
        out_specs=pl.BlockSpec((tm, f_out), lambda i, k: (i, 0)),
        out_shape=jax.ShapeDtypeStruct((n_out_p, f_out), jnp.float32),
        compiler_params=_compiler_params(vmem),
        cost_estimate=pl.CostEstimate(flops=int(flops), transcendentals=0,
                                      bytes_accessed=int(bytes_accessed)),
    )(adj_p, s_p, b_p, own_p, wuh_p, wux_p, bu_p)


def dual_gcn_union_pallas(adj_p, s_ab_p, b_ab_p, own_p, wuh_p, wux_p, bu_p,
                          *, tm, tk, alpha, split):
    n_out_p, n_in_p = adj_p.shape
    f_ab = s_ab_p.shape[1]
    f_a = split
    f_b = f_ab - split
    f_own = own_p.shape[1]
    f_out = wuh_p.shape[1]
    grid = (n_out_p // tm, n_in_p // tk)
    s_resident = s_ab_p.size * 2 <= _S_RESIDENT_BYTES

    flops = 2 * n_out_p * n_in_p * f_ab + 2 * n_out_p * (f_b + f_own) * f_out
    s_bytes = s_ab_p.size * 2 * (1 if s_resident else grid[0])
    bytes_accessed = (adj_p.size * 2 + s_bytes + own_p.size * 2
                      + (wuh_p.size + wux_p.size) * 2
                      + n_out_p * (f_a * 2 + f_out * 4))
    vmem = (2 * tm * tk * 2
            + (s_ab_p.size * 2 if s_resident else 2 * tk * f_ab * 2)
            + 2 * tm * f_own * 2 + 2 * tm * (f_a * 2 + f_out * 4)
            + tm * f_ab * 4 + (wuh_p.size + wux_p.size) * 2 + _MIB)

    return pl.pallas_call(
        functools.partial(_dual_gcn_union_kernel, alpha=alpha, tk=tk,
                          split=split, s_resident=s_resident),
        grid=grid,
        in_specs=[
            pl.BlockSpec((tm, tk), lambda i, k: (i, k)),         # shared adj tile
            _s_spec(s_ab_p, tk, s_resident),                     # S = [S_a | S_b]
            pl.BlockSpec((1, f_ab), lambda i, k: (0, 0)),        # concat bias
            pl.BlockSpec((tm, f_own), lambda i, k: (i, 0)),      # own feature rows
            pl.BlockSpec((f_b, f_out), lambda i, k: (0, 0)),     # union W (GCN half)
            pl.BlockSpec((f_own, f_out), lambda i, k: (0, 0)),   # union W (feat half)
            pl.BlockSpec((1, f_out), lambda i, k: (0, 0)),       # union bias
        ],
        out_specs=(
            pl.BlockSpec((tm, f_a), lambda i, k: (i, 0)),
            pl.BlockSpec((tm, f_out), lambda i, k: (i, 0)),
        ),
        out_shape=(
            jax.ShapeDtypeStruct((n_out_p, f_a), jnp.bfloat16),   # branch-A GCN out
            jax.ShapeDtypeStruct((n_out_p, f_out), jnp.float32),  # fused union out
        ),
        scratch_shapes=[pltpu.VMEM((tm, f_ab), jnp.float32)],
        compiler_params=_compiler_params(vmem),
        cost_estimate=pl.CostEstimate(flops=int(flops), transcendentals=0,
                                      bytes_accessed=int(bytes_accessed)),
    )(adj_p, s_ab_p, b_ab_p, own_p, wuh_p, wux_p, bu_p)


# ---------------------------------------------------------------------------
# DGCNLayer forward
# ---------------------------------------------------------------------------
def prepare_params(params, feature_dim, hidden_dim):
    """One-time prep: pad feature dims to 128 lanes, cast weights to bf16,
    pre-split/transpose the union Linear weights (torch [out, 2F] layout),
    and pre-concatenate the gc1/gc4 biases for the dual kernel."""
    Fp = _round_up(feature_dim, _LANE)
    Hp = _round_up(hidden_dim, _LANE)
    bf = jnp.bfloat16
    prep = {
        "gc1_w": _pad2d(params["gc1_w"], Fp, Hp, bf),
        "gc1_b": _pad_bias(params["gc1_b"], Hp),
        "gc2_w": _pad2d(params["gc2_w"], Fp, Hp, bf),
        "gc2_b": _pad_bias(params["gc2_b"], Hp),
        "gc3_w": _pad2d(params["gc3_w"], Hp, Fp, bf),
        "gc3_b": _pad_bias(params["gc3_b"], Fp),
        "gc4_w": _pad2d(params["gc4_w"], Hp, Fp, bf),
        "gc4_b": _pad_bias(params["gc4_b"], Fp),
        "uu_wh": _pad2d(params["uu_w"][:, :feature_dim].T, Fp, Fp, bf),
        "uu_wx": _pad2d(params["uu_w"][:, feature_dim:].T, Fp, Fp, bf),
        "uu_b": _pad_bias(params["uu_b"], Fp),
        "iu_wh": _pad2d(params["iu_w"][:, :feature_dim].T, Fp, Fp, bf),
        "iu_wx": _pad2d(params["iu_w"][:, feature_dim:].T, Fp, Fp, bf),
        "iu_b": _pad_bias(params["iu_b"], Fp),
    }
    prep["gc14_b"] = jnp.concatenate([prep["gc1_b"], prep["gc4_b"]], axis=1)
    return prep


def dgcn_layer_forward(prep, ufea, vfea, UV_adj, VU_adj, alpha):
    n_user, feat = ufea.shape
    n_item = vfea.shape[0]
    Fp = prep["gc1_w"].shape[0]
    Hp = prep["gc1_w"].shape[1]
    bf = jnp.bfloat16

    tm_user, tk_user, n_user_p = _node_tiling(n_user)
    tm_item, tk_item, n_item_p = _node_tiling(n_item)

    UV_p = _pad2d(UV_adj, n_user_p, n_item_p, bf)      # [user, item]
    VU_p = _pad2d(VU_adj, n_item_p, n_user_p, bf)      # [item, user]
    ufea_p = _pad2d(ufea, n_user_p, Fp, bf)
    vfea_p = _pad2d(vfea, n_item_p, Fp, bf)

    def proj(x_bf, w_bf):
        # Hoisted X @ W projection (tiny [n,128]x[128,128] matmul, done once per
        # kernel call instead of once per row tile inside the grid).
        return jnp.dot(x_bf, w_bf, preferred_element_type=jnp.float32).astype(bf)

    # K1: gc2 over UV_adj:  item_ho1 = LReLU(UV @ (vfea@W2) + b2)   [n_user_p, Hp] bf16
    item_ho1 = gcn_pallas(UV_p, proj(vfea_p, prep["gc2_w"]), prep["gc2_b"],
                          tm=tm_user, tk=tk_item, alpha=alpha, out_dtype=bf)

    # K2: one pass over VU_adj: gc1 (bf16 out) + gc4 + fused item_union.
    # S = [ufea@W1 | item_ho1@W4] so both branches ride one N=256 MXU matmul.
    s_ab = jnp.concatenate(
        [proj(ufea_p, prep["gc1_w"]), proj(item_ho1, prep["gc4_w"])], axis=1)
    user_ho1, item_p = dual_gcn_union_pallas(
        VU_p, s_ab, prep["gc14_b"],
        vfea_p, prep["iu_wh"], prep["iu_wx"], prep["iu_b"],
        tm=tm_item, tk=tk_user, alpha=alpha, split=Hp)

    # K3: one pass over UV_adj: gc3 + fused user_union (accumulate in f32 output).
    user_p = gcn_union_pallas(
        UV_p, proj(user_ho1, prep["gc3_w"]), prep["gc3_b"],
        ufea_p, prep["uu_wh"], prep["uu_wx"], prep["uu_b"],
        tm=tm_user, tk=tk_item, alpha=alpha)

    return user_p[:n_user, :feat], item_p[:n_item, :feat]


# ---------------------------------------------------------------------------
# references
# ---------------------------------------------------------------------------
def dgcn_layer_reference_f32(params, ufea, vfea, UV_adj, VU_adj, alpha):
    def gcn_ref(x, w, b, adj):
        out = adj @ (x @ w) + b
        return jnp.maximum(out, alpha * out)

    user_ho = gcn_ref(ufea, params["gc1_w"], params["gc1_b"], VU_adj)
    item_ho = gcn_ref(vfea, params["gc2_w"], params["gc2_b"], UV_adj)
    user_ho = gcn_ref(user_ho, params["gc3_w"], params["gc3_b"], UV_adj)
    item_ho = gcn_ref(item_ho, params["gc4_w"], params["gc4_b"], VU_adj)
    user = jnp.maximum(jnp.concatenate([user_ho, ufea], 1) @ params["uu_w"].T
                       + params["uu_b"], 0.0)
    item = jnp.maximum(jnp.concatenate([item_ho, vfea], 1) @ params["iu_w"].T
                       + params["iu_b"], 0.0)
    return user, item


def dgcn_layer_reference_bf16(params, ufea, vfea, UV_adj, VU_adj, alpha):
    """Mirrors the kernel's bf16 cast points exactly (f32 accumulation)."""
    bf = jnp.bfloat16

    def mm(a, b):
        return jnp.dot(a.astype(bf), b.astype(bf),
                       preferred_element_type=jnp.float32)

    def gcn_ref(x, w, b, adj):
        out = mm(adj, mm(x, w)) + b
        return jnp.maximum(out, alpha * out)

    def union_ref(h, x, w, b, feat):
        y = mm(h, w[:, :feat].T) + mm(x, w[:, feat:].T) + b
        return jnp.maximum(y, 0.0)

    feat = ufea.shape[1]
    user_ho = gcn_ref(ufea, params["gc1_w"], params["gc1_b"], VU_adj)
    item_ho = gcn_ref(vfea, params["gc2_w"], params["gc2_b"], UV_adj)
    user_ho2 = gcn_ref(user_ho, params["gc3_w"], params["gc3_b"], UV_adj)
    item_ho2 = gcn_ref(item_ho, params["gc4_w"], params["gc4_b"], VU_adj)
    user = union_ref(user_ho2, ufea, params["uu_w"], params["uu_b"], feat)
    item = union_ref(item_ho2, vfea, params["iu_w"], params["iu_b"], feat)
    return user, item


# ---------------------------------------------------------------------------
# deterministic parameter init (torch layouts: GCN W [nfeat, nhid], Linear [out, in])
# ---------------------------------------------------------------------------
def init_params(key, feature_dim, hidden_dim):
    ks = jax.random.split(key, 12)
    u = lambda k, shape, s: jax.random.uniform(k, shape, jnp.float32, -s, s)
    return {
        "gc1_w": u(ks[0], (feature_dim, hidden_dim), 0.1),
        "gc1_b": u(ks[1], (hidden_dim,), 0.1),
        "gc2_w": u(ks[2], (feature_dim, hidden_dim), 0.1),
        "gc2_b": u(ks[3], (hidden_dim,), 0.1),
        "gc3_w": u(ks[4], (hidden_dim, feature_dim), 0.1),
        "gc3_b": u(ks[5], (feature_dim,), 0.1),
        "gc4_w": u(ks[6], (hidden_dim, feature_dim), 0.1),
        "gc4_b": u(ks[7], (feature_dim,), 0.1),
        "uu_w": u(ks[8], (feature_dim, 2 * feature_dim), 0.1),
        "uu_b": u(ks[9], (feature_dim,), 0.1),
        "iu_w": u(ks[10], (feature_dim, 2 * feature_dim), 0.1),
        "iu_b": u(ks[11], (feature_dim,), 0.1),
    }


if __name__ == "__main__":
    feature_dim = 32
    hidden_dim = 16
    n_user = 16
    n_item = 8
    alpha = 0.2   # opt['leakey']

    key = jax.random.PRNGKey(0)
    kp, ku, kv, ka = jax.random.split(key, 4)

    params = init_params(kp, feature_dim, hidden_dim)
    prep = prepare_params(params, feature_dim, hidden_dim)

    ufea = jax.random.normal(ku, (n_user, feature_dim), jnp.float32)
    vfea = jax.random.normal(kv, (n_item, feature_dim), jnp.float32)
    UV_adj = (jax.random.uniform(ka, (n_user, n_item)) > 0.5).astype(jnp.float32)
    UV_adj = UV_adj / jnp.maximum(UV_adj.sum(axis=1, keepdims=True), 1.0)
    VU_adj = jnp.transpose(UV_adj) * 0.5

    user, item = dgcn_layer_forward(prep, ufea, vfea, UV_adj, VU_adj, alpha)
    jax.block_until_ready((user, item))

    assert user.shape == (n_user, feature_dim) and item.shape == (n_item, feature_dim)

    # Tight check against a reference with identical bf16 cast points.
    user_bf, item_bf = dgcn_layer_reference_bf16(params, ufea, vfea, UV_adj, VU_adj, alpha)
    assert jnp.allclose(user, user_bf, atol=2e-3, rtol=2e-3)
    assert jnp.allclose(item, item_bf, atol=2e-3, rtol=2e-3)

    # Loose sanity check against the pure-f32 module semantics.
    user_f32, item_f32 = dgcn_layer_reference_f32(params, ufea, vfea, UV_adj, VU_adj, alpha)
    assert jnp.allclose(user, user_f32, atol=3e-2, rtol=3e-2)
    assert jnp.allclose(item, item_f32, atol=3e-2, rtol=3e-2)

    print("KERNEL_OK")
</pallas_src>

<mosaic_0001>
module attributes {stable_mosaic.version = 11 : i64} {
  func.func @_gcn_kernel(%arg0: i32, %arg1: i32, %arg2: memref<128x128xbf16, #tpu.memory_space<vmem>>, %arg3: memref<128x128xbf16, #tpu.memory_space<vmem>>, %arg4: memref<1x128xf32, #tpu.memory_space<vmem>>, %arg5: memref<128x128xbf16, #tpu.memory_space<vmem>>, %arg6: memref<128x128xf32, #tpu.memory_space<vmem>>) attributes {dimension_semantics = [#tpu.dimension_semantics<parallel>, #tpu.dimension_semantics<arbitrary>], iteration_bounds = array<i64: 1, 1>, scalar_prefetch = 0 : i64, scratch_operands = 1 : i64, tpu.core_type = #tpu.core_type<tc>, window_params = [{transform_indices = @transform_0, window_bounds = array<i64: 128, 128>}, {pipeline_mode = #tpu.pipeline_mode<synchronous>, transform_indices = @transform_1, window_bounds = array<i64: 128, 128>}, {pipeline_mode = #tpu.pipeline_mode<synchronous>, transform_indices = @transform_2, window_bounds = array<i64: 1, 128>}, {transform_indices = @transform_3, window_bounds = array<i64: 128, 128>}]} {
    %c0_i32 = arith.constant 0 : i32
    %0 = arith.cmpi eq, %arg1, %c0_i32 : i32
    %1 = arith.extui %0 : i1 to i32
    %c0_i32_0 = arith.constant 0 : i32
    %2 = arith.cmpi ne, %1, %c0_i32_0 : i32
    scf.if %2 {
      %cst_9 = arith.constant 0.000000e+00 : f32
      %15 = vector.broadcast %cst_9 : f32 to vector<128x128xf32>
      %c0_10 = arith.constant 0 : index
      %c0_11 = arith.constant 0 : index
      %16 = vector.load %arg6[%c0_10, %c0_11] : memref<128x128xf32, #tpu.memory_space<vmem>>, vector<128x128xf32>
      tpu.vector_store %arg6[%c0_10, %c0_11], %15 {strides = array<i32>} : memref<128x128xf32, #tpu.memory_space<vmem>>, vector<128x128xf32>,
    } else {
    }
    %c128_i32 = arith.constant 128 : i32
    %3 = arith.muli %arg1, %c128_i32 : i32
    %4 = tpu.assume_multiple %3, 128 : i32
    %5 = arith.index_cast %4 : i32 to index
    %c0 = arith.constant 0 : index
    %6 = vector.load %arg3[%5, %c0] : memref<128x128xbf16, #tpu.memory_space<vmem>>, vector<128x128xbf16>
    %c0_1 = arith.constant 0 : index
    %c0_2 = arith.constant 0 : index
    %7 = vector.load %arg6[%c0_1, %c0_2] : memref<128x128xf32, #tpu.memory_space<vmem>>, vector<128x128xf32>
    %c0_3 = arith.constant 0 : index
    %c0_4 = arith.constant 0 : index
    %8 = vector.load %arg2[%c0_3, %c0_4] : memref<128x128xbf16, #tpu.memory_space<vmem>>, vector<128x128xbf16>
    %cst = arith.constant dense<0.000000e+00> : vector<128x128xf32>
    %9 = tpu.matmul %8, %6, %cst {dimension_numbers = #tpu.dot_dimension_numbers<[1], [0], [0], [1], [0, 0, 1, 1], [], []>} : vector<128x128xbf16>, vector<128x128xbf16>, vector<128x128xf32> -> vector<128x128xf32>
    %10 = arith.addf %7, %9 : vector<128x128xf32>
    %c0_5 = arith.constant 0 : index
    %c0_6 = arith.constant 0 : index
    %11 = vector.load %arg6[%c0_5, %c0_6] : memref<128x128xf32, #tpu.memory_space<vmem>>, vector<128x128xf32>
    tpu.vector_store %arg6[%c0_5, %c0_6], %10 {strides = array<i32>} : memref<128x128xf32, #tpu.memory_space<vmem>>, vector<128x128xf32>,
    %c0_i32_7 = arith.constant 0 : i32
    %12 = arith.cmpi eq, %arg1, %c0_i32_7 : i32
    %13 = arith.extui %12 : i1 to i32
    %c0_i32_8 = arith.constant 0 : i32
    %14 = arith.cmpi ne, %13, %c0_i32_8 : i32
    scf.if %14 {
      %c0_9 = arith.constant 0 : index
      %c0_10 = arith.constant 0 : index
      %15 = vector.load %arg6[%c0_9, %c0_10] : memref<128x128xf32, #tpu.memory_space<vmem>>, vector<128x128xf32>
      %c0_11 = arith.constant 0 : index
      %c0_12 = arith.constant 0 : index
      %16 = vector.load %arg4[%c0_11, %c0_12] : memref<1x128xf32, #tpu.memory_space<vmem>>, vector<1x128xf32>
      %17 = vector.broadcast %16 : vector<1x128xf32> to vector<128x128xf32>
      %18 = arith.addf %15, %17 : vector<128x128xf32>
      %cst_13 = arith.constant 2.000000e-01 : f32
      %19 = vector.broadcast %cst_13 : f32 to vector<128x128xf32>
      %20 = arith.mulf %19, %18 : vector<128x128xf32>
      %21 = arith.maximumf %18, %20 : vector<128x128xf32>
      %22 = arith.truncf %21 : vector<128x128xf32> to vector<128x128xbf16>
      %c0_14 = arith.constant 0 : index
      %c0_15 = arith.constant 0 : index
      %23 = vector.load %arg5[%c0_14, %c0_15] : memref<128x128xbf16, #tpu.memory_space<vmem>>, vector<128x128xbf16>
      tpu.vector_store %arg5[%c0_14, %c0_15], %22 {strides = array<i32>} : memref<128x128xbf16, #tpu.memory_space<vmem>>, vector<128x128xbf16>,
    } else {
    }
    return
  }
  func.func @transform_0(%arg0: i32, %arg1: i32) -> (i32, i32) {
    %c0_i32 = arith.constant 0 : i32
    return %arg0, %arg1 : i32, i32
  }
  func.func @transform_1(%arg0: i32, %arg1: i32) -> (i32, i32) {
    %c0_i32 = arith.constant 0 : i32
    %c0_i32_0 = arith.constant 0 : i32
    %c0_i32_1 = arith.constant 0 : i32
    return %c0_i32, %c0_i32_0 : i32, i32
  }
  func.func @transform_2(%arg0: i32, %arg1: i32) -> (i32, i32) {
    %c0_i32 = arith.constant 0 : i32
    %c0_i32_0 = arith.constant 0 : i32
    %c0_i32_1 = arith.constant 0 : i32
    return %c0_i32, %c0_i32_0 : i32, i32
  }
  func.func @transform_3(%arg0: i32, %arg1: i32) -> (i32, i32) {
    %c0_i32 = arith.constant 0 : i32
    %c0_i32_0 = arith.constant 0 : i32
    return %arg0, %c0_i32 : i32, i32
  }
}

</mosaic_0001>

<bundles_post_ra>
// kernel: tpu_custom_call.1
= control target key start
LH: loop header
LB: loop body
LE: loop exit
PB: predicated region body
PF: predicated region fallthrough
CT: control target
= control target key end

     0   :  { %8 = vsyncpa [#allocation4], 0  ;;  %s809_s0 = inlined_call_operand.hbm [shape: bf16[128,128], index: 0, kind: input, shape index: {}]   ;;  %s810_s1 = inlined_call_operand.hbm [shape: bf16[128,128], index: 1, kind: input, shape index: {}]   ;;  %s811_s2 = inlined_call_operand.vmem [shape: f32[1,128], index: 2, kind: input, shape index: {}]   ;;  %s812_s3 = inlined_call_operand.hbm [shape: bf16[128,128], index: 3, kind: output, shape index: {}]  }
   0x1   :  { %9 = vsyncpa [#allocation7], 0 }
   0x2   :  { %10 = vsyncpa [#allocation5], 0  ;;  %s763_s12 = smov [#allocation3]  }
   0x3   :  { %s16_s13 = sshll.u32 %s763_s12, 4  ;;  %s17_s13 = int_to_ptr.vmem [resolvable:$true] %s16_s13 }
   0x4   :  { %s705_s14 = scalar_lea.vmem %s17_s13, 1024  ;;  %p710_p1 = scmp.lt.s32.totalorder %s17_s13, %s17_s13 }
   0x5   :  { %p706_p0 = scmp.ne.s32.totalorder %s17_s13, %s705_s14  ;;  %p711_p2 = scmp.lt.s32.totalorder %s705_s14, %s705_s14 }
   0x7   :  { %p712_p3 = por %p711_p2, %p710_p1 }
   0x9   :  { %p713_p4 = pnand %p712_p3, %p706_p0 }
   0xb   :  { %716 = shalt.err (!%p713_p4)
}
   0xc   :  { %s764_s15 = smov 64   ;;  %s765_s16 = smov 4  }
   0xd   :  { %22 = dma.hbm_to_vmem [thread:$0]  %s809_s0, 1024, %s17_s13, [#allocation4], %s764_s15, %s764_s15, %s765_s16  }
   0xe   :  { %s766_s19 = smov [#allocation6]  }
   0xf   :  { %s28_s20 = sshll.u32 %s766_s19, 4  ;;  %s29_s20 = int_to_ptr.vmem [resolvable:$true] %s28_s20 }
  0x10   :  { %s725_s21 = scalar_lea.vmem %s29_s20, 1024  ;;  %p730_p6 = scmp.lt.s32.totalorder %s29_s20, %s29_s20 }
  0x11   :  { %p726_p5 = scmp.ne.s32.totalorder %s29_s20, %s725_s21  ;;  %p731_p7 = scmp.lt.s32.totalorder %s725_s21, %s725_s21 }
  0x13   :  { %p732_p8 = por %p731_p7, %p730_p6 }
  0x15   :  { %p733_p9 = pnand %p732_p8, %p726_p5 }
  0x17   :  { %736 = shalt.err (!%p733_p9)
}
  0x18   :  { %34 = dma.hbm_to_vmem [thread:$0]  %s810_s1, 1024, %s29_s20, [#allocation7], %s764_s15, %s764_s15, %s765_s16  }
  0x19   :  { %757 = dma.done.wait [#allocation4], 1024  }
  0x1a   :  { %758 = vsyncadd [#allocation4], 4294966272 }
  0x1b   :  { %759 = dma.done.wait [#allocation7], 1024  }
  0x1c   :  { %760 = vsyncadd [#allocation7], 4294966272  ;;  %v681_v0 = vld [vmem:[#allocation6 + $0x38] sm:$0xff]   ;;  %v682_v1 = vld [vmem:[#allocation6 + $0x30] sm:$0xff]  }
  0x1d   :  { %628 = vmatprep.subr.bf16.mxu0 %v681_v0  ;;  %660 = vmatprep.subr.bf16.mxu1 %v681_v0  ;;  %v683_v2 = vld [vmem:[#allocation6 + $0x28] sm:$0xff]   ;;  %v684_v3 = vld [vmem:[#allocation6 + $0x20] sm:$0xff]   ;;  %v685_v6 = vld [vmem:[#allocation6 + $0x18] sm:$0xff]  }
  0x1e   :  { %629 = vmatpush3.bf16.msra.mxu0 %v681_v0  ;;  %668 = vmatpush3.bf16.msra.mxu1 %v681_v0  ;;  %v689_v4 = vld [vmem:[#allocation3] sm:$0xff]   ;;  %v686_v7 = vld [vmem:[#allocation6 + $0x10] sm:$0xff]   ;;  %v687_v8 = vld [vmem:[#allocation6 + $0x8] sm:$0xff]  }
  0x1f   :  { %630 = vmatprep.subr.bf16.mxu0 %v682_v1  ;;  %661 = vmatprep.subr.bf16.mxu1 %v682_v1  ;;  %v690_v5 = vld [vmem:[#allocation3 + $0x20] sm:$0xff]   ;;  %v691_v10 = vld [vmem:[#allocation3 + $0x8] sm:$0xff]   ;;  %v693_v12 = vld [vmem:[#allocation3 + $0x10] sm:$0xff]  }
  0x20   :  { %644 = vmatprep.mubr.bf16.mxu0 %v689_v4  ;;  %652 = vmatprep.mubr.bf16.mxu1 %v690_v5  ;;  %v688_v9 = vld [vmem:[#allocation6] sm:$0xff]   ;;  %v692_v11 = vld [vmem:[#allocation3 + $0x28] sm:$0xff]   ;;  %v694_v13 = vld [vmem:[#allocation3 + $0x30] sm:$0xff]  }
  0x21   :  { %v695_v14 = vld [vmem:[#allocation3 + $0x18] sm:$0xff]   ;;  %v532_v16 = vld [vmem:[%s811_s2] ss:$0 sm:$0xff]  ;;  %s767_s2 = smov [#allocation8]  }
  0x22   :  { %631 = vmatpush3.bf16.msra.mxu0 %v682_v1  ;;  %669 = vmatpush3.bf16.msra.mxu1 %v682_v1  ;;  %v696_v15 = vld [vmem:[#allocation3 + $0x38] sm:$0xff]   ;;  %s501_s24 = sshll.u32 %s767_s2, 4  ;;  %s502_s24 = int_to_ptr.vmem [resolvable:$true] %s501_s24 }
  0x23   :  { %632 = vmatprep.subr.bf16.mxu0 %v683_v2  ;;  %662 = vmatprep.subr.bf16.mxu1 %v683_v2  ;;  %s737_s25 = scalar_lea.vmem %s502_s24, 1024  ;;  %p742_p11 = scmp.lt.s32.totalorder %s502_s24, %s502_s24 }
  0x24   :  { %p738_p10 = scmp.ne.s32.totalorder %s502_s24, %s737_s25  ;;  %p743_p12 = scmp.lt.s32.totalorder %s737_s25, %s737_s25 }
  0x26   :  { %633 = vmatpush3.bf16.msra.mxu0 %v683_v2  ;;  %670 = vmatpush3.bf16.msra.mxu1 %v683_v2  ;;  %p744_p13 = por %p743_p12, %p742_p11 }
  0x27   :  { %634 = vmatprep.subr.bf16.mxu0 %v684_v3  ;;  %663 = vmatprep.subr.bf16.mxu1 %v684_v3 }
  0x28   :  { %p745_p0 = pnand %p744_p13, %p738_p10 }
  0x2a   :  { %635 = vmatpush3.bf16.msra.mxu0 %v684_v3  ;;  %671 = vmatpush3.bf16.msra.mxu1 %v684_v3 }
  0x2b   :  { %636 = vmatprep.subr.bf16.mxu0 %v685_v6  ;;  %664 = vmatprep.subr.bf16.mxu1 %v685_v6 }
  0x2e   :  { %637 = vmatpush3.bf16.msra.mxu0 %v685_v6  ;;  %672 = vmatpush3.bf16.msra.mxu1 %v685_v6 }
  0x2f   :  { %638 = vmatprep.subr.bf16.mxu0 %v686_v7  ;;  %665 = vmatprep.subr.bf16.mxu1 %v686_v7 }
  0x32   :  { %639 = vmatpush3.bf16.msra.mxu0 %v686_v7  ;;  %673 = vmatpush3.bf16.msra.mxu1 %v686_v7 }
  0x33   :  { %640 = vmatprep.subr.bf16.mxu0 %v687_v8  ;;  %666 = vmatprep.subr.bf16.mxu1 %v687_v8 }
  0x36   :  { %641 = vmatpush3.bf16.msra.mxu0 %v687_v8  ;;  %674 = vmatpush3.bf16.msra.mxu1 %v687_v8 }
  0x37   :  { %642 = vmatprep.subr.bf16.mxu0 %v688_v9  ;;  %667 = vmatprep.subr.bf16.mxu1 %v688_v9 }
  0x3a   :  { %643 = vmatpush3.bf16.msra.mxu0 %v688_v9  ;;  %675 = vmatpush3.bf16.msra.mxu1 %v688_v9 }
  0x3d   :  { %645 = vmatmul.mubr.bf16.vlgmr.msra.gmra.mxu0 %v691_v10  ;;  %653 = vmatmul.mubr.bf16.vlgmr.msra.gmra.mxu1 %v692_v11 }
  0x3e   :  { %648 = vmatprep.mubr.bf16.mxu0 %v693_v12  ;;  %656 = vmatprep.mubr.bf16.mxu1 %v694_v13 }
  0x45   :  { %649 = vmatmul.mubr.bf16.gmra.mxu0 %v695_v14  ;;  %657 = vmatmul.mubr.bf16.gmra.mxu1 %v696_v15 }
  0xfd   :  { %v646_v17 = vpop.f32.mrf.mxu0  ;;  %v654_v18 = vpop.f32.mrf.mxu1 }
  0xfe   :  { %v370_v19 = vadd.f32 %v646_v17, %v532_v16  ;;  %v378_v20 = vadd.f32 %v654_v18, %v532_v16 }
  0xff   :  { %v247_v21 = vpop.f32.mrf.mxu0  ;;  %v279_v22 = vpop.f32.mrf.mxu1 }
 0x100   :  { %v368_v23 = vadd.f32 %v532_v16, %v247_v21  ;;  %v376_v24 = vadd.f32 %v532_v16, %v279_v22  ;;  %v386_v27 = vmul.f32 0.2, %v370_v19  ;;  %v394_v28 = vmul.f32 0.2, %v378_v20 }
 0x101   :  { %v647_v25 = vpop.f32.mrf.mxu0  ;;  %v655_v26 = vpop.f32.mrf.mxu1 }
 0x102   :  { %v371_v29 = vadd.f32 %v647_v25, %v532_v16  ;;  %v379_v30 = vadd.f32 %v655_v26, %v532_v16  ;;  %v384_v33 = vmul.f32 0.2, %v368_v23  ;;  %v392_v34 = vmul.f32 0.2, %v376_v24 }
 0x103   :  { %v250_v31 = vpop.f32.mrf.mxu0  ;;  %v282_v32 = vpop.f32.mrf.mxu1  ;;  %v402_v41 = vmax.f32 %v370_v19, %v386_v27  ;;  %v410_v42 = vmax.f32 %v378_v20, %v394_v28 }
 0x104   :  { %v369_v35 = vadd.f32 %v532_v16, %v250_v31  ;;  %v377_v36 = vadd.f32 %v532_v16, %v282_v32  ;;  %v387_v37 = vmul.f32 0.2, %v371_v29  ;;  %v395_v38 = vmul.f32 0.2, %v379_v30 }
 0x105   :  { %v650_v39 = vpop.f32.mrf.mxu0  ;;  %v658_v40 = vpop.f32.mrf.mxu1  ;;  %v400_v51 = vmax.f32 %v368_v23, %v384_v33  ;;  %v408_v52 = vmax.f32 %v376_v24, %v392_v34 }
 0x106   :  { %v385_v43 = vmul.f32 0.2, %v369_v35  ;;  %v393_v44 = vmul.f32 0.2, %v377_v36  ;;  %v403_v45 = vmax.f32 %v371_v29, %v387_v37  ;;  %v411_v46 = vmax.f32 %v379_v30, %v395_v38 }
 0x107   :  { %v374_v47 = vadd.f32 %v650_v39, %v532_v16  ;;  %v382_v48 = vadd.f32 %v658_v40, %v532_v16  ;;  %v263_v49 = vpop.f32.mrf.mxu0  ;;  %v295_v50 = vpop.f32.mrf.mxu1 }
 0x108   :  { %v401_v53 = vmax.f32 %v369_v35, %v385_v43  ;;  %v409_v54 = vmax.f32 %v377_v36, %v393_v44  ;;  %v573_v55 = vpack.c.bf16 %v403_v45, %v402_v41  ;;  %v593_v56 = vpack.c.bf16 %v411_v46, %v410_v42 }
 0x109   :  { %v372_v57 = vadd.f32 %v532_v16, %v263_v49  ;;  %v380_v58 = vadd.f32 %v532_v16, %v295_v50  ;;  %v651_v59 = vpop.f32.mrf.mxu0  ;;  %v659_v60 = vpop.f32.mrf.mxu1  ;;  %v390_v63 = vmul.f32 0.2, %v374_v47  ;;  %v398_v0 = vmul.f32 0.2, %v382_v48 }
 0x10a   :  { %v568_v61 = vpack.c.bf16 %v401_v53, %v400_v51  ;;  %v588_v62 = vpack.c.bf16 %v409_v54, %v408_v52  ;;  %605 = vst [vmem:[#allocation8 + $0x8] sm:$0xff] %v573_v55   ;;  %609 = vst [vmem:[#allocation8 + $0x28] sm:$0xff] %v593_v56   ;;  %v375_v1 = vadd.f32 %v651_v59, %v532_v16 }
 0x10b   :  { %v383_v2 = vadd.f32 %v659_v60, %v532_v16  ;;  %v266_v3 = vpop.f32.mrf.mxu0  ;;  %v298_v4 = vpop.f32.mrf.mxu1  ;;  %v388_v5 = vmul.f32 0.2, %v372_v57  ;;  %v396_v6 = vmul.f32 0.2, %v380_v58  ;;  %v406_v13 = vmax.f32 %v374_v47, %v390_v63 }
 0x10c   :  { %569 = vst [vmem:[#allocation8] sm:$0xff] %v568_v61   ;;  %608 = vst [vmem:[#allocation8 + $0x20] sm:$0xff] %v588_v62   ;;  %v373_v7 = vadd.f32 %v532_v16, %v266_v3  ;;  %v381_v8 = vadd.f32 %v532_v16, %v298_v4  ;;  %v391_v9 = vmul.f32 0.2, %v375_v1  ;;  %v414_v14 = vmax.f32 %v382_v48, %v398_v0 }
 0x10d   :  { %v399_v10 = vmul.f32 0.2, %v383_v2  ;;  %v404_v18 = vmax.f32 %v372_v57, %v388_v5  ;;  %v412_v19 = vmax.f32 %v380_v58, %v396_v6 }
 0x10e   :  { %v389_v11 = vmul.f32 0.2, %v373_v7  ;;  %v397_v12 = vmul.f32 0.2, %v381_v8  ;;  %v407_v15 = vmax.f32 %v375_v1, %v391_v9 }
 0x10f   :  { %v415_v17 = vmax.f32 %v383_v2, %v399_v10 }
 0x110   :  { %v405_v20 = vmax.f32 %v373_v7, %v389_v11  ;;  %v413_v21 = vmax.f32 %v381_v8, %v397_v12  ;;  %v583_v22 = vpack.c.bf16 %v407_v15, %v406_v13 }
 0x111   :  { %v603_v23 = vpack.c.bf16 %v415_v17, %v414_v14 }
 0x112   :  { %v578_v24 = vpack.c.bf16 %v405_v20, %v404_v18  ;;  %v598_v25 = vpack.c.bf16 %v413_v21, %v412_v19  ;;  %607 = vst [vmem:[#allocation8 + $0x18] sm:$0xff] %v583_v22  }
 0x113   :  { %611 = vst [vmem:[#allocation8 + $0x38] sm:$0xff] %v603_v23  }
 0x114   :  { %606 = vst [vmem:[#allocation8 + $0x10] sm:$0xff] %v578_v24   ;;  %610 = vst [vmem:[#allocation8 + $0x30] sm:$0xff] %v598_v25  }
 0x115   :  { %748 = shalt.err (!%p745_p0)
}
 0x116   :  { %507 = dma.vmem_to_hbm [thread:$0]  %s502_s24, 1024, %s812_s3, [#allocation5], %s764_s15, %s764_s15, %s765_s16  }
 0x117   :  { %761 = dma.done.wait [#allocation5], 1024  }
 0x118   :  { %762 = vsyncadd [#allocation5], 4294966272 }
 0x119   :  { %511 = vsyncpa [#allocation4], 1 }
 0x11a   :  { %512 = vsyncpa [#allocation7], 1 }
 0x11b   :  { %513 = vsyncpa [#allocation5], 1 }

</bundles_post_ra>
